<compile_context>
chip_gen: v7x
topology: tpu7x:2x2x1
jax: 0.10.0
libtpu: 0.0.40
codegen_flags: <defaults>
</compile_context>

<pallas_src>
import functools

import jax
import jax.numpy as jnp
from jax.experimental import pallas as pl
from jax.experimental.pallas import tpu as pltpu


# ----------------------------- Pallas kernel --------------------------------
def fusion_kernel(gf_ref, bf_ref, wg_ref, wb_ref, b_ref, ln_g_ref, ln_b_ref,
                  out_ref, *, compute_dtype, inv_h):
    """One token tile: folded fusion matmuls -> tanh -> single-pass LayerNorm."""
    # Cast to the MXU operand dtype inside the kernel (cheap VPU op hidden under
    # the matmul) instead of materializing a casted HBM copy in the wrapper.
    gf = gf_ref[...].astype(compute_dtype)
    bf = bf_ref[...].astype(compute_dtype)

    acc = jnp.dot(gf, wg_ref[...], preferred_element_type=jnp.float32)
    acc = acc + jnp.dot(bf, wb_ref[...], preferred_element_type=jnp.float32)
    fused = jnp.tanh(acc + b_ref[...])                      # f32 (VPU + EUP)

    # Single-pass LayerNorm over the hidden dim (population variance, eps=1e-5).
    row_sum = jnp.sum(fused, axis=-1, keepdims=True)
    row_sq = jnp.sum(fused * fused, axis=-1, keepdims=True)
    mean = row_sum * inv_h
    var = row_sq * inv_h - mean * mean
    out = (fused - mean) * jax.lax.rsqrt(var + 1e-5) * ln_g_ref[...] + ln_b_ref[...]
    out_ref[...] = out.astype(out_ref.dtype)


# ----------------------- one-time parameter preparation ----------------------
def prepare_fused_params(params, *, compute_dtype=jnp.bfloat16):
    """Fold the concat fusion ONCE (amortized across all forward calls).

      fused_pre = gf @ (Wg @ Wf_top) + bf @ (Wb @ Wf_bot)
                  + (bg @ Wf_top + bb @ Wf_bot + bf_bias)
    """
    H = params["wg"].shape[-1]
    wf_top = params["wf"][:H, :]                          # (H, H)
    wf_bot = params["wf"][H:, :]                          # (H, H)
    wg_f = (params["wg"] @ wf_top).astype(compute_dtype)  # (Dg, H)
    wb_f = (params["wb"] @ wf_bot).astype(compute_dtype)  # (Db, H)
    b_f = (params["bg"] @ wf_top + params["bb"] @ wf_bot
           + params["bf"]).astype(jnp.float32)            # (1, H)
    return {
        "wg_f": wg_f, "wb_f": wb_f, "b_f": b_f,
        "ln_g": params["ln_g"].astype(jnp.float32),
        "ln_b": params["ln_b"].astype(jnp.float32),
        "compute_dtype": compute_dtype,
    }


# ------------------------------ forward wrapper -------------------------------
def fusion_layer_forward(gpt2_features, bert_features, attention_mask,
                         fused_params, *, block_rows=1024, out_dtype=None):
    # attention_mask is unused by FusionLayer.forward (PyTorch reference semantics).
    del attention_mask

    compute_dtype = fused_params["compute_dtype"]
    wg_f, wb_f = fused_params["wg_f"], fused_params["wb_f"]
    b_f, ln_g, ln_b = fused_params["b_f"], fused_params["ln_g"], fused_params["ln_b"]

    B, S, Dg = gpt2_features.shape
    Db = bert_features.shape[-1]
    H = wg_f.shape[-1]
    if out_dtype is None:
        out_dtype = compute_dtype

    # Flatten the token axis; NO padding and NO dtype-cast copies in the wrapper.
    T = B * S
    gf = gpt2_features.reshape(T, Dg)
    bf = bert_features.reshape(T, Db)

    if T <= block_rows:
        block_rows = T                              # full-dim block is always legal
    else:
        block_rows = max(8, (block_rows // 8) * 8)  # keep sublane alignment

    # ---- VMEM budget, sized against the physical capacity of this chip ------
    itm_c = jnp.dtype(compute_dtype).itemsize
    itm_in = jnp.dtype(gf.dtype).itemsize
    itm_out = jnp.dtype(out_dtype).itemsize
    try:
        vmem_cap = int(pltpu.get_tpu_info().vmem_capacity_bytes)
    except Exception:
        vmem_cap = 64 << 20                         # conservative: v7x per-TC VMEM

    def footprint(rows):
        weights = (Dg + Db) * H * itm_c + 3 * H * 4    # single-buffered residents
        feats = 2 * rows * (Dg + Db) * itm_in          # double-buffered input tiles
        outs = 2 * rows * H * itm_out                  # double-buffered output tiles
        scratch = 4 * rows * H * 4                     # f32 acc/fused intermediates
        return weights + feats + outs + scratch

    while T > block_rows > 64 and footprint(block_rows) > (vmem_cap * 3) // 5:
        block_rows = max(64, block_rows // 2)

    n_tiles = pl.cdiv(T, block_rows)
    vmem_limit = int(min(max(int(1.5 * footprint(block_rows)), 4 << 20),
                         (vmem_cap * 3) // 4))

    cost = pl.CostEstimate(
        flops=2 * T * (Dg + Db) * H + 12 * T * H,
        transcendentals=T * H + T,
        bytes_accessed=(T * (Dg + Db) * itm_in + (Dg + Db) * H * itm_c
                        + T * H * itm_out + 3 * H * 4),
    )

    kernel = functools.partial(fusion_kernel, compute_dtype=compute_dtype,
                               inv_h=1.0 / H)

    def build(single_buffer_weights):
        def resident_spec(shape):
            if single_buffer_weights:
                return pl.BlockSpec(shape, lambda i: (0, 0),
                                    pipeline_mode=pl.Buffered(1))
            return pl.BlockSpec(shape, lambda i: (0, 0))

        def row_spec(d):
            return pl.BlockSpec((block_rows, d), lambda i: (i, 0))

        return pl.pallas_call(
            kernel,
            out_shape=jax.ShapeDtypeStruct((T, H), out_dtype),
            grid=(n_tiles,),
            in_specs=[
                row_spec(Dg), row_spec(Db),
                resident_spec(wg_f.shape), resident_spec(wb_f.shape),
                resident_spec(b_f.shape), resident_spec(ln_g.shape),
                resident_spec(ln_b.shape),
            ],
            out_specs=pl.BlockSpec((block_rows, H), lambda i: (i, 0)),
            compiler_params=pltpu.CompilerParams(
                dimension_semantics=("parallel",),
                vmem_limit_bytes=vmem_limit,
            ),
            cost_estimate=cost,
        )

    args = (gf, bf, wg_f, wb_f, b_f, ln_g, ln_b)
    try:
        out = build(single_buffer_weights=True)(*args)
    except Exception:
        # Fallback: let Pallas default-double-buffer the resident weights.
        out = build(single_buffer_weights=False)(*args)

    return out.reshape(B, S, H)


# ------------------------- pure-JAX reference (f32, unfused) -----------------
def reference_forward(gf, bf, p):
    gp = gf @ p["wg"] + p["bg"]
    bp = bf @ p["wb"] + p["bb"]
    fused = jnp.tanh(jnp.concatenate([gp, bp], axis=-1) @ p["wf"] + p["bf"])
    mean = fused.mean(-1, keepdims=True)
    var = ((fused - mean) ** 2).mean(-1, keepdims=True)
    return (fused - mean) / jnp.sqrt(var + 1e-5) * p["ln_g"] + p["ln_b"]


# -------------------------- parameter init -----------------------------------
def linear_init(key, fan_in, fan_out):
    """PyTorch nn.Linear default init: U(-1/sqrt(fan_in), 1/sqrt(fan_in))."""
    kw, kb = jax.random.split(key)
    bound = 1.0 / (fan_in ** 0.5)
    w = jax.random.uniform(kw, (fan_in, fan_out), jnp.float32, -bound, bound)
    b = jax.random.uniform(kb, (1, fan_out), jnp.float32, -bound, bound)
    return w, b


def make_params(key, gpt2_dim, bert_dim, output_dim):
    k0, k1, k2 = jax.random.split(key, 3)
    p = {}
    p["wg"], p["bg"] = linear_init(k0, gpt2_dim, output_dim)
    p["wb"], p["bb"] = linear_init(k1, bert_dim, output_dim)
    p["wf"], p["bf"] = linear_init(k2, 2 * output_dim, output_dim)
    p["ln_g"] = jnp.ones((1, output_dim), jnp.float32)
    p["ln_b"] = jnp.zeros((1, output_dim), jnp.float32)
    return p


# ------------------------------- main ----------------------------------------
if __name__ == "__main__":
    B, S = 2, 8
    GPT2_DIM, BERT_DIM, HIDDEN = 32, 32, 32

    key = jax.random.PRNGKey(0)
    k_gf, k_bf, k_p = jax.random.split(key, 3)

    gpt2_features = jax.random.normal(k_gf, (B, S, GPT2_DIM), jnp.float32)
    bert_features = jax.random.normal(k_bf, (B, S, BERT_DIM), jnp.float32)
    attention_mask = jnp.array([[1] * S, [1] * (S - 3) + [0] * 3], jnp.float32)

    params = make_params(k_p, GPT2_DIM, BERT_DIM, HIDDEN)
    ref = reference_forward(gpt2_features, bert_features, params)

    # f32 path: tight gating check of the folded-fusion kernel.
    p_f32 = prepare_fused_params(params, compute_dtype=jnp.float32)
    out_f32 = fusion_layer_forward(gpt2_features, bert_features, attention_mask,
                                   p_f32, out_dtype=jnp.float32)
    jax.block_until_ready(out_f32)
    assert jnp.allclose(out_f32, ref, atol=1e-4, rtol=1e-4), "f32 kernel mismatch"

    # bf16 production path: bf16 MXU operands + bf16 output, f32 accumulation/LN.
    p_bf16 = prepare_fused_params(params, compute_dtype=jnp.bfloat16)
    out_bf16 = fusion_layer_forward(gpt2_features, bert_features, attention_mask,
                                    p_bf16)
    jax.block_until_ready(out_bf16)
    err = jnp.max(jnp.abs(out_bf16.astype(jnp.float32) - ref))
    assert err < 0.15, f"bf16 kernel drifted too far: {err}"

    # TODO(synk): the frozen GPT-2 / DistilBERT backbones that produce these
    #             hidden-state features are external and not re-implemented here.
    print("KERNEL_OK")
</pallas_src>

<mosaic_0001>
module attributes {stable_mosaic.version = 11 : i64} {
  func.func @fusion_kernel(%arg0: i32, %arg1: memref<16x32xf32, #tpu.memory_space<vmem>>, %arg2: memref<16x32xf32, #tpu.memory_space<vmem>>, %arg3: memref<32x32xf32, #tpu.memory_space<vmem>>, %arg4: memref<32x32xf32, #tpu.memory_space<vmem>>, %arg5: memref<1x32xf32, #tpu.memory_space<vmem>>, %arg6: memref<1x32xf32, #tpu.memory_space<vmem>>, %arg7: memref<1x32xf32, #tpu.memory_space<vmem>>, %arg8: memref<16x32xf32, #tpu.memory_space<vmem>>) attributes {dimension_semantics = [#tpu.dimension_semantics<parallel>], iteration_bounds = array<i64: 1>, scalar_prefetch = 0 : i64, scratch_operands = 0 : i64, tpu.core_type = #tpu.core_type<tc>, window_params = [{transform_indices = @transform_0, window_bounds = array<i64: 16, 32>}, {transform_indices = @transform_1, window_bounds = array<i64: 16, 32>}, {pipeline_mode = #tpu.pipeline_mode<synchronous>, transform_indices = @transform_2, window_bounds = array<i64: 32, 32>}, {pipeline_mode = #tpu.pipeline_mode<synchronous>, transform_indices = @transform_3, window_bounds = array<i64: 32, 32>}, {pipeline_mode = #tpu.pipeline_mode<synchronous>, transform_indices = @transform_4, window_bounds = array<i64: 1, 32>}, {pipeline_mode = #tpu.pipeline_mode<synchronous>, transform_indices = @transform_5, window_bounds = array<i64: 1, 32>}, {pipeline_mode = #tpu.pipeline_mode<synchronous>, transform_indices = @transform_6, window_bounds = array<i64: 1, 32>}, {transform_indices = @transform_7, window_bounds = array<i64: 16, 32>}]} {
    %c0 = arith.constant 0 : index
    %c0_0 = arith.constant 0 : index
    %0 = vector.load %arg1[%c0, %c0_0] : memref<16x32xf32, #tpu.memory_space<vmem>>, vector<16x32xf32>
    %c0_1 = arith.constant 0 : index
    %c0_2 = arith.constant 0 : index
    %1 = vector.load %arg2[%c0_1, %c0_2] : memref<16x32xf32, #tpu.memory_space<vmem>>, vector<16x32xf32>
    %c0_3 = arith.constant 0 : index
    %c0_4 = arith.constant 0 : index
    %2 = vector.load %arg3[%c0_3, %c0_4] : memref<32x32xf32, #tpu.memory_space<vmem>>, vector<32x32xf32>
    %cst = arith.constant dense<0.000000e+00> : vector<16x32xf32>
    %3 = tpu.matmul %0, %2, %cst {dimension_numbers = #tpu.dot_dimension_numbers<[1], [0], [0], [1], [0, 0, 1, 1], [], []>} : vector<16x32xf32>, vector<32x32xf32>, vector<16x32xf32> -> vector<16x32xf32>
    %c0_5 = arith.constant 0 : index
    %c0_6 = arith.constant 0 : index
    %4 = vector.load %arg4[%c0_5, %c0_6] : memref<32x32xf32, #tpu.memory_space<vmem>>, vector<32x32xf32>
    %cst_7 = arith.constant dense<0.000000e+00> : vector<16x32xf32>
    %5 = tpu.matmul %1, %4, %cst_7 {dimension_numbers = #tpu.dot_dimension_numbers<[1], [0], [0], [1], [0, 0, 1, 1], [], []>} : vector<16x32xf32>, vector<32x32xf32>, vector<16x32xf32> -> vector<16x32xf32>
    %6 = arith.addf %3, %5 : vector<16x32xf32>
    %c0_8 = arith.constant 0 : index
    %c0_9 = arith.constant 0 : index
    %7 = vector.load %arg5[%c0_8, %c0_9] : memref<1x32xf32, #tpu.memory_space<vmem>>, vector<1x32xf32>
    %8 = vector.broadcast %7 : vector<1x32xf32> to vector<16x32xf32>
    %9 = arith.addf %6, %8 : vector<16x32xf32>
    %10 = math.tanh %9 : vector<16x32xf32>
    %cst_10 = arith.constant dense<0.000000e+00> : vector<16xf32>
    %11 = vector.multi_reduction <add>, %10, %cst_10 [1] : vector<16x32xf32> to vector<16xf32>
    %12 = vector.shape_cast %11 : vector<16xf32> to vector<16x1xf32>
    %13 = arith.mulf %10, %10 : vector<16x32xf32>
    %cst_11 = arith.constant dense<0.000000e+00> : vector<16xf32>
    %14 = vector.multi_reduction <add>, %13, %cst_11 [1] : vector<16x32xf32> to vector<16xf32>
    %15 = vector.shape_cast %14 : vector<16xf32> to vector<16x1xf32>
    %cst_12 = arith.constant 3.125000e-02 : f32
    %16 = vector.broadcast %cst_12 : f32 to vector<16x1xf32>
    %17 = arith.mulf %12, %16 : vector<16x1xf32>
    %cst_13 = arith.constant 3.125000e-02 : f32
    %18 = vector.broadcast %cst_13 : f32 to vector<16x1xf32>
    %19 = arith.mulf %15, %18 : vector<16x1xf32>
    %20 = arith.mulf %17, %17 : vector<16x1xf32>
    %21 = arith.subf %19, %20 : vector<16x1xf32>
    %22 = vector.broadcast %17 : vector<16x1xf32> to vector<16x32xf32>
    %23 = arith.subf %10, %22 : vector<16x32xf32>
    %cst_14 = arith.constant 9.99999974E-6 : f32
    %24 = vector.broadcast %cst_14 : f32 to vector<16x1xf32>
    %25 = arith.addf %21, %24 : vector<16x1xf32>
    %26 = math.rsqrt %25 : vector<16x1xf32>
    %27 = vector.broadcast %26 : vector<16x1xf32> to vector<16x32xf32>
    %28 = arith.mulf %23, %27 : vector<16x32xf32>
    %c0_15 = arith.constant 0 : index
    %c0_16 = arith.constant 0 : index
    %29 = vector.load %arg6[%c0_15, %c0_16] : memref<1x32xf32, #tpu.memory_space<vmem>>, vector<1x32xf32>
    %30 = vector.broadcast %29 : vector<1x32xf32> to vector<16x32xf32>
    %31 = arith.mulf %28, %30 : vector<16x32xf32>
    %c0_17 = arith.constant 0 : index
    %c0_18 = arith.constant 0 : index
    %32 = vector.load %arg7[%c0_17, %c0_18] : memref<1x32xf32, #tpu.memory_space<vmem>>, vector<1x32xf32>
    %33 = vector.broadcast %32 : vector<1x32xf32> to vector<16x32xf32>
    %34 = arith.addf %31, %33 : vector<16x32xf32>
    %c0_19 = arith.constant 0 : index
    %c0_20 = arith.constant 0 : index
    %35 = vector.load %arg8[%c0_19, %c0_20] : memref<16x32xf32, #tpu.memory_space<vmem>>, vector<16x32xf32>
    tpu.vector_store %arg8[%c0_19, %c0_20], %34 {strides = array<i32>} : memref<16x32xf32, #tpu.memory_space<vmem>>, vector<16x32xf32>,
    return
  }
  func.func @transform_0(%arg0: i32) -> (i32, i32) {
    %c0_i32 = arith.constant 0 : i32
    %c0_i32_0 = arith.constant 0 : i32
    return %arg0, %c0_i32 : i32, i32
  }
  func.func @transform_1(%arg0: i32) -> (i32, i32) {
    %c0_i32 = arith.constant 0 : i32
    %c0_i32_0 = arith.constant 0 : i32
    return %arg0, %c0_i32 : i32, i32
  }
  func.func @transform_2(%arg0: i32) -> (i32, i32) {
    %c0_i32 = arith.constant 0 : i32
    %c0_i32_0 = arith.constant 0 : i32
    %c0_i32_1 = arith.constant 0 : i32
    return %c0_i32, %c0_i32_0 : i32, i32
  }
  func.func @transform_3(%arg0: i32) -> (i32, i32) {
    %c0_i32 = arith.constant 0 : i32
    %c0_i32_0 = arith.constant 0 : i32
    %c0_i32_1 = arith.constant 0 : i32
    return %c0_i32, %c0_i32_0 : i32, i32
  }
  func.func @transform_4(%arg0: i32) -> (i32, i32) {
    %c0_i32 = arith.constant 0 : i32
    %c0_i32_0 = arith.constant 0 : i32
    %c0_i32_1 = arith.constant 0 : i32
    return %c0_i32, %c0_i32_0 : i32, i32
  }
  func.func @transform_5(%arg0: i32) -> (i32, i32) {
    %c0_i32 = arith.constant 0 : i32
    %c0_i32_0 = arith.constant 0 : i32
    %c0_i32_1 = arith.constant 0 : i32
    return %c0_i32, %c0_i32_0 : i32, i32
  }
  func.func @transform_6(%arg0: i32) -> (i32, i32) {
    %c0_i32 = arith.constant 0 : i32
    %c0_i32_0 = arith.constant 0 : i32
    %c0_i32_1 = arith.constant 0 : i32
    return %c0_i32, %c0_i32_0 : i32, i32
  }
  func.func @transform_7(%arg0: i32) -> (i32, i32) {
    %c0_i32 = arith.constant 0 : i32
    %c0_i32_0 = arith.constant 0 : i32
    return %arg0, %c0_i32 : i32, i32
  }
}

module attributes {stable_mosaic.version = 11 : i64} {
  func.func @fusion_kernel(%arg0: i32, %arg1: memref<16x32xf32, #tpu.memory_space<vmem>>, %arg2: memref<16x32xf32, #tpu.memory_space<vmem>>, %arg3: memref<32x32xf32, #tpu.memory_space<vmem>>, %arg4: memref<32x32xf32, #tpu.memory_space<vmem>>, %arg5: memref<1x32xf32, #tpu.memory_space<vmem>>, %arg6: memref<1x32xf32, #tpu.memory_space<vmem>>, %arg7: memref<1x32xf32, #tpu.memory_space<vmem>>, %arg8: memref<16x32xf32, #tpu.memory_space<vmem>>) attributes {dimension_semantics = [#tpu.dimension_semantics<parallel>], iteration_bounds = array<i64: 1>, scalar_prefetch = 0 : i64, scratch_operands = 0 : i64, tpu.core_type = #tpu.core_type<tc>, window_params = [{transform_indices = @transform_0, window_bounds = array<i64: 16, 32>}, {transform_indices = @transform_1, window_bounds = array<i64: 16, 32>}, {pipeline_mode = #tpu.pipeline_mode<synchronous>, transform_indices = @transform_2, window_bounds = array<i64: 32, 32>}, {pipeline_mode = #tpu.pipeline_mode<synchronous>, transform_indices = @transform_3, window_bounds = array<i64: 32, 32>}, {pipeline_mode = #tpu.pipeline_mode<synchronous>, transform_indices = @transform_4, window_bounds = array<i64: 1, 32>}, {pipeline_mode = #tpu.pipeline_mode<synchronous>, transform_indices = @transform_5, window_bounds = array<i64: 1, 32>}, {pipeline_mode = #tpu.pipeline_mode<synchronous>, transform_indices = @transform_6, window_bounds = array<i64: 1, 32>}, {transform_indices = @transform_7, window_bounds = array<i64: 16, 32>}]} {
    %c0 = arith.constant 0 : index
    %c0_0 = arith.constant 0 : index
    %0 = vector.load %arg1[%c0, %c0_0] : memref<16x32xf32, #tpu.memory_space<vmem>>, vector<16x32xf32>
    %c0_1 = arith.constant 0 : index
    %c0_2 = arith.constant 0 : index
    %1 = vector.load %arg2[%c0_1, %c0_2] : memref<16x32xf32, #tpu.memory_space<vmem>>, vector<16x32xf32>
    %c0_3 = arith.constant 0 : index
    %c0_4 = arith.constant 0 : index
    %2 = vector.load %arg3[%c0_3, %c0_4] : memref<32x32xf32, #tpu.memory_space<vmem>>, vector<32x32xf32>
    %cst = arith.constant dense<0.000000e+00> : vector<16x32xf32>
    %3 = tpu.matmul %0, %2, %cst {dimension_numbers = #tpu.dot_dimension_numbers<[1], [0], [0], [1], [0, 0, 1, 1], [], []>} : vector<16x32xf32>, vector<32x32xf32>, vector<16x32xf32> -> vector<16x32xf32>
    %c0_5 = arith.constant 0 : index
    %c0_6 = arith.constant 0 : index
    %4 = vector.load %arg4[%c0_5, %c0_6] : memref<32x32xf32, #tpu.memory_space<vmem>>, vector<32x32xf32>
    %cst_7 = arith.constant dense<0.000000e+00> : vector<16x32xf32>
    %5 = tpu.matmul %1, %4, %cst_7 {dimension_numbers = #tpu.dot_dimension_numbers<[1], [0], [0], [1], [0, 0, 1, 1], [], []>} : vector<16x32xf32>, vector<32x32xf32>, vector<16x32xf32> -> vector<16x32xf32>
    %6 = arith.addf %3, %5 : vector<16x32xf32>
    %c0_8 = arith.constant 0 : index
    %c0_9 = arith.constant 0 : index
    %7 = vector.load %arg5[%c0_8, %c0_9] : memref<1x32xf32, #tpu.memory_space<vmem>>, vector<1x32xf32>
    %8 = vector.broadcast %7 : vector<1x32xf32> to vector<16x32xf32>
    %9 = arith.addf %6, %8 : vector<16x32xf32>
    %10 = math.tanh %9 : vector<16x32xf32>
    %cst_10 = arith.constant dense<0.000000e+00> : vector<16xf32>
    %11 = vector.multi_reduction <add>, %10, %cst_10 [1] : vector<16x32xf32> to vector<16xf32>
    %12 = vector.shape_cast %11 : vector<16xf32> to vector<16x1xf32>
    %13 = arith.mulf %10, %10 : vector<16x32xf32>
    %cst_11 = arith.constant dense<0.000000e+00> : vector<16xf32>
    %14 = vector.multi_reduction <add>, %13, %cst_11 [1] : vector<16x32xf32> to vector<16xf32>
    %15 = vector.shape_cast %14 : vector<16xf32> to vector<16x1xf32>
    %cst_12 = arith.constant 3.125000e-02 : f32
    %16 = vector.broadcast %cst_12 : f32 to vector<16x1xf32>
    %17 = arith.mulf %12, %16 : vector<16x1xf32>
    %cst_13 = arith.constant 3.125000e-02 : f32
    %18 = vector.broadcast %cst_13 : f32 to vector<16x1xf32>
    %19 = arith.mulf %15, %18 : vector<16x1xf32>
    %20 = arith.mulf %17, %17 : vector<16x1xf32>
    %21 = arith.subf %19, %20 : vector<16x1xf32>
    %22 = vector.broadcast %17 : vector<16x1xf32> to vector<16x32xf32>
    %23 = arith.subf %10, %22 : vector<16x32xf32>
    %cst_14 = arith.constant 9.99999974E-6 : f32
    %24 = vector.broadcast %cst_14 : f32 to vector<16x1xf32>
    %25 = arith.addf %21, %24 : vector<16x1xf32>
    %26 = math.rsqrt %25 : vector<16x1xf32>
    %27 = vector.broadcast %26 : vector<16x1xf32> to vector<16x32xf32>
    %28 = arith.mulf %23, %27 : vector<16x32xf32>
    %c0_15 = arith.constant 0 : index
    %c0_16 = arith.constant 0 : index
    %29 = vector.load %arg6[%c0_15, %c0_16] : memref<1x32xf32, #tpu.memory_space<vmem>>, vector<1x32xf32>
    %30 = vector.broadcast %29 : vector<1x32xf32> to vector<16x32xf32>
    %31 = arith.mulf %28, %30 : vector<16x32xf32>
    %c0_17 = arith.constant 0 : index
    %c0_18 = arith.constant 0 : index
    %32 = vector.load %arg7[%c0_17, %c0_18] : memref<1x32xf32, #tpu.memory_space<vmem>>, vector<1x32xf32>
    %33 = vector.broadcast %32 : vector<1x32xf32> to vector<16x32xf32>
    %34 = arith.addf %31, %33 : vector<16x32xf32>
    %c0_19 = arith.constant 0 : index
    %c0_20 = arith.constant 0 : index
    %35 = vector.load %arg8[%c0_19, %c0_20] : memref<16x32xf32, #tpu.memory_space<vmem>>, vector<16x32xf32>
    tpu.vector_store %arg8[%c0_19, %c0_20], %34 {strides = array<i32>} : memref<16x32xf32, #tpu.memory_space<vmem>>, vector<16x32xf32>,
    return
  }
  func.func @transform_0(%arg0: i32) -> (i32, i32) {
    %c0_i32 = arith.constant 0 : i32
    %c0_i32_0 = arith.constant 0 : i32
    return %arg0, %c0_i32 : i32, i32
  }
  func.func @transform_1(%arg0: i32) -> (i32, i32) {
    %c0_i32 = arith.constant 0 : i32
    %c0_i32_0 = arith.constant 0 : i32
    return %arg0, %c0_i32 : i32, i32
  }
  func.func @transform_2(%arg0: i32) -> (i32, i32) {
    %c0_i32 = arith.constant 0 : i32
    %c0_i32_0 = arith.constant 0 : i32
    %c0_i32_1 = arith.constant 0 : i32
    return %c0_i32, %c0_i32_0 : i32, i32
  }
  func.func @transform_3(%arg0: i32) -> (i32, i32) {
    %c0_i32 = arith.constant 0 : i32
    %c0_i32_0 = arith.constant 0 : i32
    %c0_i32_1 = arith.constant 0 : i32
    return %c0_i32, %c0_i32_0 : i32, i32
  }
  func.func @transform_4(%arg0: i32) -> (i32, i32) {
    %c0_i32 = arith.constant 0 : i32
    %c0_i32_0 = arith.constant 0 : i32
    %c0_i32_1 = arith.constant 0 : i32
    return %c0_i32, %c0_i32_0 : i32, i32
  }
  func.func @transform_5(%arg0: i32) -> (i32, i32) {
    %c0_i32 = arith.constant 0 : i32
    %c0_i32_0 = arith.constant 0 : i32
    %c0_i32_1 = arith.constant 0 : i32
    return %c0_i32, %c0_i32_0 : i32, i32
  }
  func.func @transform_6(%arg0: i32) -> (i32, i32) {
    %c0_i32 = arith.constant 0 : i32
    %c0_i32_0 = arith.constant 0 : i32
    %c0_i32_1 = arith.constant 0 : i32
    return %c0_i32, %c0_i32_0 : i32, i32
  }
  func.func @transform_7(%arg0: i32) -> (i32, i32) {
    %c0_i32 = arith.constant 0 : i32
    %c0_i32_0 = arith.constant 0 : i32
    return %arg0, %c0_i32 : i32, i32
  }
}

</mosaic_0001>

<bundles_post_ra>
// kernel: tpu_custom_call.1
= control target key start
LH: loop header
LB: loop body
LE: loop exit
PB: predicated region body
PF: predicated region fallthrough
CT: control target
= control target key end

     0   :  { %12 = vsyncpa [#allocation3], 0  ;;  %s684_s0 = inlined_call_operand.hbm [shape: f32[16,32], index: 0, kind: input, shape index: {}]   ;;  %s685_s1 = inlined_call_operand.hbm [shape: f32[16,32], index: 1, kind: input, shape index: {}]   ;;  %s686_s2 = inlined_call_operand.hbm [shape: f32[32,32], index: 2, kind: input, shape index: {}]   ;;  %s687_s3 = inlined_call_operand.hbm [shape: f32[32,32], index: 3, kind: input, shape index: {}]   ;;  %s688_s4 = inlined_call_operand.vmem [shape: f32[1,32], index: 4, kind: input, shape index: {}]   ;;  %s689_s5 = inlined_call_operand.vmem [shape: f32[1,32], index: 5, kind: input, shape index: {}]   ;;  %s690_s6 = inlined_call_operand.vmem [shape: f32[1,32], index: 6, kind: input, shape index: {}]   ;;  %s691_s7 = inlined_call_operand.hbm [shape: f32[16,32], index: 7, kind: output, shape index: {}]  }
   0x1   :  { %13 = vsyncpa [#allocation6], 0 }
   0x2   :  { %14 = vsyncpa [#allocation9], 0 }
   0x3   :  { %15 = vsyncpa [#allocation4], 0  ;;  %s529_s24 = smov [#allocation5]   ;;  %s530_s26 = smov [#allocation2]  }
   0x4   :  { %s33_s25 = sshll.u32 %s529_s24, 4  ;;  %s21_s27 = sshll.u32 %s530_s26, 4  ;;  %s34_s25 = int_to_ptr.vmem [resolvable:$true] %s33_s25  ;;  %s576_s27 = int_to_ptr.vmem [resolvable:$true] %s21_s27 }
   0x5   :  { %s411_s30 = scalar_lea.hbm %s685_s1, 256 }
   0x6   :  { %p412_p0 = scmp.ne.s32.totalorder %s685_s1, %s411_s30  ;;  %p415_p1 = scmp.lt.u32.totalorder %s411_s30, %s685_s1 }
   0x8   :  { %p417_p2 = pnand %p415_p1, %p412_p0 }
   0xa   :  { %420 = shalt.err (!%p417_p2)
}
   0xb   :  { %s421_s12 = scalar_lea.vmem %s34_s25, 256  ;;  %p426_p4 = scmp.lt.s32.totalorder %s34_s25, %s34_s25 }
   0xc   :  { %p422_p3 = scmp.ne.s32.totalorder %s34_s25, %s421_s12  ;;  %p427_p5 = scmp.lt.s32.totalorder %s421_s12, %s421_s12 }
   0xe   :  { %p428_p6 = por %p427_p5, %p426_p4 }
  0x10   :  { %p429_p7 = pnand %p428_p6, %p422_p3 }
  0x12   :  { %432 = shalt.err (!%p429_p7)
}
  0x13   :  { %s531_s13 = smov 128   ;;  %s532_s14 = smov 8  }
  0x14   :  { %39 = dma.hbm_to_vmem [thread:$0]  %s685_s1, 256, %s34_s25, [#allocation6], %s531_s13, %s531_s13, %s532_s14  }
  0x15   :  { %s433_s19 = scalar_lea.hbm %s684_s0, 256 }
  0x16   :  { %p434_p8 = scmp.ne.s32.totalorder %s684_s0, %s433_s19  ;;  %p437_p9 = scmp.lt.u32.totalorder %s433_s19, %s684_s0 }
  0x18   :  { %p439_p10 = pnand %p437_p9, %p434_p8 }
  0x1a   :  { %442 = shalt.err (!%p439_p10)
}
  0x1b   :  { %s443_s24 = scalar_lea.vmem %s576_s27, 256  ;;  %p448_p12 = scmp.lt.s32.totalorder %s576_s27, %s576_s27 }
  0x1c   :  { %p444_p11 = scmp.ne.s32.totalorder %s576_s27, %s443_s24  ;;  %p449_p13 = scmp.lt.s32.totalorder %s443_s24, %s443_s24 }
  0x1e   :  { %p450_p0 = por %p449_p13, %p448_p12 }
  0x20   :  { %p451_p1 = pnand %p450_p0, %p444_p11 }
  0x22   :  { %454 = shalt.err (!%p451_p1)
}
  0x23   :  { %27 = dma.hbm_to_vmem [thread:$0]  %s684_s0, 256, %s576_s27, [#allocation3], %s531_s13, %s531_s13, %s532_s14  }
  0x24   :  { %s533_s26 = smov [#allocation7]   ;;  %s534_s29 = smov [#allocation8]  }
  0x25   :  { %s45_s28 = sshll.u32 %s533_s26, 4  ;;  %s57_s30 = sshll.u32 %s534_s29, 4  ;;  %s46_s28 = int_to_ptr.vmem [resolvable:$true] %s45_s28  ;;  %s613_s30 = int_to_ptr.vmem [resolvable:$true] %s57_s30 }
  0x26   :  { %s455_s10 = scalar_lea.hbm %s686_s2, 512 }
  0x27   :  { %p456_p2 = scmp.ne.s32.totalorder %s686_s2, %s455_s10  ;;  %p459_p3 = scmp.lt.u32.totalorder %s455_s10, %s686_s2 }
  0x29   :  { %p461_p4 = pnand %p459_p3, %p456_p2 }
  0x2b   :  { %464 = shalt.err (!%p461_p4)
}
  0x2c   :  { %s465_s0 = scalar_lea.vmem %s46_s28, 512  ;;  %p470_p6 = scmp.lt.s32.totalorder %s46_s28, %s46_s28 }
  0x2d   :  { %p466_p5 = scmp.ne.s32.totalorder %s46_s28, %s465_s0  ;;  %p471_p7 = scmp.lt.s32.totalorder %s465_s0, %s465_s0 }
  0x2f   :  { %p472_p8 = por %p471_p7, %p470_p6 }
  0x31   :  { %p473_p9 = pnand %p472_p8, %p466_p5 }
  0x33   :  { %476 = shalt.err (!%p473_p9)
}
  0x34   :  { %51 = dma.hbm_to_vmem [thread:$0]  %s686_s2, 512, %s46_s28, [#allocation6], %s531_s13, %s531_s13, %s532_s14  }
  0x35   :  { %s477_s20 = scalar_lea.hbm %s687_s3, 512 }
  0x36   :  { %p478_p10 = scmp.ne.s32.totalorder %s687_s3, %s477_s20  ;;  %p481_p11 = scmp.lt.u32.totalorder %s477_s20, %s687_s3 }
  0x38   :  { %p483_p12 = pnand %p481_p11, %p478_p10 }
  0x3a   :  { %486 = shalt.err (!%p483_p12)
}
  0x3b   :  { %s487_s1 = scalar_lea.vmem %s613_s30, 512  ;;  %p492_p0 = scmp.lt.s32.totalorder %s613_s30, %s613_s30 }
  0x3c   :  { %p488_p13 = scmp.ne.s32.totalorder %s613_s30, %s487_s1  ;;  %p493_p1 = scmp.lt.s32.totalorder %s487_s1, %s487_s1 }
  0x3e   :  { %p494_p2 = por %p493_p1, %p492_p0 }
  0x40   :  { %p495_p3 = pnand %p494_p2, %p488_p13 }
  0x42   :  { %498 = shalt.err (!%p495_p3)
}
  0x43   :  { %63 = dma.hbm_to_vmem [thread:$0]  %s687_s3, 512, %s613_s30, [#allocation9], %s531_s13, %s531_s13, %s532_s14  }
  0x44   :  { %521 = dma.done.wait [#allocation3], 256  }
  0x45   :  { %522 = vsyncadd [#allocation3], 4294967040 }
  0x46   :  { %523 = dma.done.wait [#allocation6], 768  }
  0x47   :  { %524 = vsyncadd [#allocation6], 4294966528 }
  0x48   :  { %525 = dma.done.wait [#allocation9], 512  }
  0x49   :  { %526 = vsyncadd [#allocation9], 4294966784  ;;  %v90_v0 = vld [vmem:[#allocation8] sm:$0xff]  ;;  %v91_v1 = vld [vmem:[#allocation8 + $0x8] sm:$0xff]  ;;  %vm94_vm0 = vcmask 261120   ;;  %s535_s8 = smov [#allocation10]  }
  0x4a   :  { %v86_v2 = vld [vmem:[#allocation7] sm:$0xff]  ;;  %v378_v3 = vpack.c.bf16 %v91_v1, %v90_v0  ;;  %v87_v4 = vld [vmem:[#allocation7 + $0x8] sm:$0xff]  ;;  %v92_v5 = vld [vmem:[#allocation8 + $0x10] sm:$0xff]  ;;  %s323_s9 = sshll.u32 %s535_s8, 4  ;;  %s324_s9 = int_to_ptr.vmem [resolvable:$true] %s323_s9 }
  0x4b   :  { %v93_v6 = vld [vmem:[#allocation8 + $0x18] sm:$0xff]  ;;  %v386_v7 = vpack.c.bf16 %v87_v4, %v86_v2  ;;  %v88_v9 = vld [vmem:[#allocation7 + $0x10] sm:$0xff]  ;;  %v82_v13 = vld [vmem:[#allocation2] sm:$0xff]  ;;  %p504_p5 = scmp.lt.s32.totalorder %s324_s9, %s324_s9 }
  0x4c   :  { %v382_v8 = vpack.c.bf16 %v93_v6, %v92_v5  ;;  %v89_v10 = vld [vmem:[#allocation7 + $0x18] sm:$0xff]  ;;  %v84_v11 = vld [vmem:[#allocation5] sm:$0xff]  ;;  %379 = vmatprep.subr.bf16.mxu1 %v378_v3  ;;  %375 = vmatprep.mubr.msk.f32.mxu0 %vm94_vm0, %v82_v13  ;;  %v83_v15 = vld [vmem:[#allocation2 + $0x8] sm:$0xff] }
  0x4d   :  { %v390_v12 = vpack.c.bf16 %v89_v10, %v88_v9  ;;  %364 = vmatprep.mubr.msk.f32.mxu1 %vm94_vm0, %v84_v11  ;;  %387 = vmatprep.subr.bf16.mxu0 %v386_v7  ;;  %v85_v14 = vld [vmem:[#allocation5 + $0x8] sm:$0xff]  ;;  %v341_v18 = vld [vmem:[%s688_s4] ss:$0 sm:$0xff] }
  0x4e   :  { %381 = vmatpush3.bf16.msra.mxu1 %v378_v3  ;;  %389 = vmatpush3.bf16.msra.mxu0 %v386_v7  ;;  %v342_v49 = vld [vmem:[%s689_s5] ss:$0 sm:$0xff]  ;;  %s499_s5 = scalar_lea.vmem %s324_s9, 256 }
  0x4f   :  { %383 = vmatprep.subr.bf16.mxu1 %v382_v8  ;;  %391 = vmatprep.subr.bf16.mxu0 %v390_v12  ;;  %v343_v51 = vld [vmem:[%s690_s6] ss:$0 sm:$0xff]  ;;  %p500_p4 = scmp.ne.s32.totalorder %s324_s9, %s499_s5  ;;  %p505_p6 = scmp.lt.s32.totalorder %s499_s5, %s499_s5 }
  0x51   :  { %p506_p7 = por %p505_p6, %p504_p5 }
  0x52   :  { %385 = vmatpush3.bf16.msra.mxu1 %v382_v8  ;;  %393 = vmatpush3.bf16.msra.mxu0 %v390_v12 }
  0x53   :  { %p507_p8 = pnand %p506_p7, %p500_p4 }
  0x55   :  { %365 = vmatmul.mubr.msk.f32.vlgmr.msra.gmra.mrb[0].mxu1 %vm94_vm0, %v85_v14  ;;  %376 = vmatmul.mubr.msk.f32.vlgmr.msra.gmra.mrb[0].mxu0 %vm94_vm0, %v83_v15 }
 0x128   :  { %v366_v16 = vpop.f32.mrb[0].mxu1  ;;  %v377_v17 = vpop.f32.mrb[0].mxu0 }
 0x129   :  { %v167_v19 = vpop.f32.mrb[1].mxu1  ;;  %v254_v20 = vadd.f32 %v377_v17, %v366_v16  ;;  %v248_v21 = vpop.f32.mrb[1].mxu0 }
 0x12a   :  { %v249_v22 = vadd.f32 %v248_v21, %v167_v19 }
 0x12b   :  { %v265_v23 = vadd.f32 %v341_v18, %v254_v20 }
 0x12c   :  { %v264_v24 = vadd.f32 %v341_v18, %v249_v22 }
 0x12d   :  { %403 = vtanh.f32 %v265_v23 }
 0x12e   :  { %405 = vtanh.f32 %v264_v24 }
 0x137   :  { %v404_v25 = vpop.eup %403 }
 0x138   :  { %v406_v26 = vpop.eup %405  ;;  %v275_v30 = vmul.f32 %v404_v25, %v404_v25  ;;  %v271_v31 = vsel %vm94_vm0, %v404_v25, 0.0 }
 0x139   :  { %v268_v27 = vsel %vm94_vm0, %v406_v26, 0.0  ;;  %v274_v28 = vmul.f32 %v406_v26, %v406_v26 }
 0x13a   :  { %269 = vadd.xlane.f32.xlu0 %v268_v27  ;;  %v279_v32 = vsel %vm94_vm0, %v275_v30, 0.0 }
 0x13b   :  { %v276_v29 = vsel %vm94_vm0, %v274_v28, 0.0 }
 0x13c   :  { %277 = vadd.xlane.f32.xlu1 %v276_v29 }
 0x13e   :  { %272 = vadd.xlane.f32.xlu0 %v271_v31 }
 0x140   :  { %280 = vadd.xlane.f32.xlu1 %v279_v32 }
 0x1c7   :  { %v270_v33 = vpop.xlane.xlu0 %269 }
 0x1c8   :  { %v282_v34 = vmul.f32 0.03125, %v270_v33 }
 0x1c9   :  { %v278_v35 = vpop.xlane.xlu1 %277 }
 0x1ca   :  { %v286_v36 = vmul.f32 %v282_v34, %v282_v34  ;;  %v284_v37 = vmul.f32 0.03125, %v278_v35  ;;  %v290_v47 = vsub.f32 %v406_v26, %v282_v34 }
 0x1cb   :  { %v273_v38 = vpop.xlane.xlu0 %272 }
 0x1cc   :  { %v288_v39 = vsub.f32 %v284_v37, %v286_v36  ;;  %v283_v40 = vmul.f32 0.03125, %v273_v38 }
 0x1cd   :  { %v281_v41 = vpop.xlane.xlu1 %280 }
 0x1ce   :  { %v292_v42 = vadd.f32 1e-05, %v288_v39  ;;  %v287_v43 = vmul.f32 %v283_v40, %v283_v40  ;;  %v285_v44 = vmul.f32 0.03125, %v281_v41  ;;  %v291_v52 = vsub.f32 %v404_v25, %v283_v40 }
 0x1d0   :  { %407 = vrsqrt.f32 %v292_v42  ;;  %v289_v45 = vsub.f32 %v285_v44, %v287_v43 }
 0x1d2   :  { %v293_v46 = vadd.f32 1e-05, %v289_v45 }
 0x1d4   :  { %409 = vrsqrt.f32 %v293_v46 }
 0x1da   :  { %v408_v48 = vpop.eup %407 }
 0x1db   :  { %v296_v50 = vmul.f32 %v408_v48, %v290_v47 }
 0x1dd   :  { %v305_v53 = vmul.f32 %v342_v49, %v296_v50 }
 0x1de   :  { %v410_v54 = vpop.eup %409 }
 0x1df   :  { %v297_v55 = vmul.f32 %v410_v54, %v291_v52  ;;  %v314_v56 = vadd.f32 %v343_v51, %v305_v53 }
 0x1e1   :  { %v306_v57 = vmul.f32 %v342_v49, %v297_v55  ;;  %316 = vst.msk [vmem:[#allocation10] sm:$0xff] %vm94_vm0, %v314_v56 }
 0x1e3   :  { %v315_v58 = vadd.f32 %v343_v51, %v306_v57 }
 0x1e5   :  { %317 = vst.msk [vmem:[#allocation10 + $0x8] sm:$0xff] %vm94_vm0, %v315_v58 }
 0x1e6   :  { %510 = shalt.err (!%p507_p8)
}
 0x1e7   :  { %s511_s11 = scalar_lea.hbm %s691_s7, 256 }
 0x1e8   :  { %p512_p9 = scmp.ne.s32.totalorder %s691_s7, %s511_s11  ;;  %p515_p10 = scmp.lt.u32.totalorder %s511_s11, %s691_s7 }
 0x1ea   :  { %p517_p11 = pnand %p515_p10, %p512_p9 }
 0x1ec   :  { %520 = shalt.err (!%p517_p11)
}
 0x1ed   :  { %329 = dma.vmem_to_hbm [thread:$0]  %s324_s9, 256, %s691_s7, [#allocation4], %s531_s13, %s531_s13, %s532_s14  }
 0x1ee   :  { %527 = dma.done.wait [#allocation4], 256  }
 0x1ef   :  { %528 = vsyncadd [#allocation4], 4294967040 }
 0x1f0   :  { %333 = vsyncpa [#allocation3], 1 }
 0x1f1   :  { %334 = vsyncpa [#allocation6], 1 }
 0x1f2   :  { %335 = vsyncpa [#allocation9], 1 }
 0x1f3   :  { %336 = vsyncpa [#allocation4], 1 }

// kernel: tpu_custom_call.1
= control target key start
LH: loop header
LB: loop body
LE: loop exit
PB: predicated region body
PF: predicated region fallthrough
CT: control target
= control target key end

     0   :  { %12 = vsyncpa [#allocation3], 0  ;;  %s684_s0 = inlined_call_operand.hbm [shape: f32[16,32], index: 0, kind: input, shape index: {}]   ;;  %s685_s1 = inlined_call_operand.hbm [shape: f32[16,32], index: 1, kind: input, shape index: {}]   ;;  %s686_s2 = inlined_call_operand.hbm [shape: f32[32,32], index: 2, kind: input, shape index: {}]   ;;  %s687_s3 = inlined_call_operand.hbm [shape: f32[32,32], index: 3, kind: input, shape index: {}]   ;;  %s688_s4 = inlined_call_operand.vmem [shape: f32[1,32], index: 4, kind: input, shape index: {}]   ;;  %s689_s5 = inlined_call_operand.vmem [shape: f32[1,32], index: 5, kind: input, shape index: {}]   ;;  %s690_s6 = inlined_call_operand.vmem [shape: f32[1,32], index: 6, kind: input, shape index: {}]   ;;  %s691_s7 = inlined_call_operand.hbm [shape: f32[16,32], index: 7, kind: output, shape index: {}]  }
   0x1   :  { %13 = vsyncpa [#allocation6], 0 }
   0x2   :  { %14 = vsyncpa [#allocation9], 0 }
   0x3   :  { %15 = vsyncpa [#allocation4], 0  ;;  %s529_s24 = smov [#allocation5]   ;;  %s530_s26 = smov [#allocation2]  }
   0x4   :  { %s33_s25 = sshll.u32 %s529_s24, 4  ;;  %s21_s27 = sshll.u32 %s530_s26, 4  ;;  %s34_s25 = int_to_ptr.vmem [resolvable:$true] %s33_s25  ;;  %s576_s27 = int_to_ptr.vmem [resolvable:$true] %s21_s27 }
   0x5   :  { %s411_s30 = scalar_lea.hbm %s685_s1, 256 }
   0x6   :  { %p412_p0 = scmp.ne.s32.totalorder %s685_s1, %s411_s30  ;;  %p415_p1 = scmp.lt.u32.totalorder %s411_s30, %s685_s1 }
   0x8   :  { %p417_p2 = pnand %p415_p1, %p412_p0 }
   0xa   :  { %420 = shalt.err (!%p417_p2)
}
   0xb   :  { %s421_s12 = scalar_lea.vmem %s34_s25, 256  ;;  %p426_p4 = scmp.lt.s32.totalorder %s34_s25, %s34_s25 }
   0xc   :  { %p422_p3 = scmp.ne.s32.totalorder %s34_s25, %s421_s12  ;;  %p427_p5 = scmp.lt.s32.totalorder %s421_s12, %s421_s12 }
   0xe   :  { %p428_p6 = por %p427_p5, %p426_p4 }
  0x10   :  { %p429_p7 = pnand %p428_p6, %p422_p3 }
  0x12   :  { %432 = shalt.err (!%p429_p7)
}
  0x13   :  { %s531_s13 = smov 128   ;;  %s532_s14 = smov 8  }
  0x14   :  { %39 = dma.hbm_to_vmem [thread:$0]  %s685_s1, 256, %s34_s25, [#allocation6], %s531_s13, %s531_s13, %s532_s14  }
  0x15   :  { %s433_s19 = scalar_lea.hbm %s684_s0, 256 }
  0x16   :  { %p434_p8 = scmp.ne.s32.totalorder %s684_s0, %s433_s19  ;;  %p437_p9 = scmp.lt.u32.totalorder %s433_s19, %s684_s0 }
  0x18   :  { %p439_p10 = pnand %p437_p9, %p434_p8 }
  0x1a   :  { %442 = shalt.err (!%p439_p10)
}
  0x1b   :  { %s443_s24 = scalar_lea.vmem %s576_s27, 256  ;;  %p448_p12 = scmp.lt.s32.totalorder %s576_s27, %s576_s27 }
  0x1c   :  { %p444_p11 = scmp.ne.s32.totalorder %s576_s27, %s443_s24  ;;  %p449_p13 = scmp.lt.s32.totalorder %s443_s24, %s443_s24 }
  0x1e   :  { %p450_p0 = por %p449_p13, %p448_p12 }
  0x20   :  { %p451_p1 = pnand %p450_p0, %p444_p11 }
  0x22   :  { %454 = shalt.err (!%p451_p1)
}
  0x23   :  { %27 = dma.hbm_to_vmem [thread:$0]  %s684_s0, 256, %s576_s27, [#allocation3], %s531_s13, %s531_s13, %s532_s14  }
  0x24   :  { %s533_s26 = smov [#allocation7]   ;;  %s534_s29 = smov [#allocation8]  }
  0x25   :  { %s45_s28 = sshll.u32 %s533_s26, 4  ;;  %s57_s30 = sshll.u32 %s534_s29, 4  ;;  %s46_s28 = int_to_ptr.vmem [resolvable:$true] %s45_s28  ;;  %s613_s30 = int_to_ptr.vmem [resolvable:$true] %s57_s30 }
  0x26   :  { %s455_s10 = scalar_lea.hbm %s686_s2, 512 }
  0x27   :  { %p456_p2 = scmp.ne.s32.totalorder %s686_s2, %s455_s10  ;;  %p459_p3 = scmp.lt.u32.totalorder %s455_s10, %s686_s2 }
  0x29   :  { %p461_p4 = pnand %p459_p3, %p456_p2 }
  0x2b   :  { %464 = shalt.err (!%p461_p4)
}
  0x2c   :  { %s465_s0 = scalar_lea.vmem %s46_s28, 512  ;;  %p470_p6 = scmp.lt.s32.totalorder %s46_s28, %s46_s28 }
  0x2d   :  { %p466_p5 = scmp.ne.s32.totalorder %s46_s28, %s465_s0  ;;  %p471_p7 = scmp.lt.s32.totalorder %s465_s0, %s465_s0 }
  0x2f   :  { %p472_p8 = por %p471_p7, %p470_p6 }
  0x31   :  { %p473_p9 = pnand %p472_p8, %p466_p5 }
  0x33   :  { %476 = shalt.err (!%p473_p9)
}
  0x34   :  { %51 = dma.hbm_to_vmem [thread:$0]  %s686_s2, 512, %s46_s28, [#allocation6], %s531_s13, %s531_s13, %s532_s14  }
  0x35   :  { %s477_s20 = scalar_lea.hbm %s687_s3, 512 }
  0x36   :  { %p478_p10 = scmp.ne.s32.totalorder %s687_s3, %s477_s20  ;;  %p481_p11 = scmp.lt.u32.totalorder %s477_s20, %s687_s3 }
  0x38   :  { %p483_p12 = pnand %p481_p11, %p478_p10 }
  0x3a   :  { %486 = shalt.err (!%p483_p12)
}
  0x3b   :  { %s487_s1 = scalar_lea.vmem %s613_s30, 512  ;;  %p492_p0 = scmp.lt.s32.totalorder %s613_s30, %s613_s30 }
  0x3c   :  { %p488_p13 = scmp.ne.s32.totalorder %s613_s30, %s487_s1  ;;  %p493_p1 = scmp.lt.s32.totalorder %s487_s1, %s487_s1 }
  0x3e   :  { %p494_p2 = por %p493_p1, %p492_p0 }
  0x40   :  { %p495_p3 = pnand %p494_p2, %p488_p13 }
  0x42   :  { %498 = shalt.err (!%p495_p3)
}
  0x43   :  { %63 = dma.hbm_to_vmem [thread:$0]  %s687_s3, 512, %s613_s30, [#allocation9], %s531_s13, %s531_s13, %s532_s14  }
  0x44   :  { %521 = dma.done.wait [#allocation3], 256  }
  0x45   :  { %522 = vsyncadd [#allocation3], 4294967040 }
  0x46   :  { %523 = dma.done.wait [#allocation6], 768  }
  0x47   :  { %524 = vsyncadd [#allocation6], 4294966528 }
  0x48   :  { %525 = dma.done.wait [#allocation9], 512  }
  0x49   :  { %526 = vsyncadd [#allocation9], 4294966784  ;;  %v90_v0 = vld [vmem:[#allocation8] sm:$0xff]  ;;  %v91_v1 = vld [vmem:[#allocation8 + $0x8] sm:$0xff]  ;;  %vm94_vm0 = vcmask 261120   ;;  %s535_s8 = smov [#allocation10]  }
  0x4a   :  { %v86_v2 = vld [vmem:[#allocation7] sm:$0xff]  ;;  %v378_v3 = vpack.c.bf16 %v91_v1, %v90_v0  ;;  %v87_v4 = vld [vmem:[#allocation7 + $0x8] sm:$0xff]  ;;  %v92_v5 = vld [vmem:[#allocation8 + $0x10] sm:$0xff]  ;;  %s323_s9 = sshll.u32 %s535_s8, 4  ;;  %s324_s9 = int_to_ptr.vmem [resolvable:$true] %s323_s9 }
  0x4b   :  { %v93_v6 = vld [vmem:[#allocation8 + $0x18] sm:$0xff]  ;;  %v386_v7 = vpack.c.bf16 %v87_v4, %v86_v2  ;;  %v88_v9 = vld [vmem:[#allocation7 + $0x10] sm:$0xff]  ;;  %v82_v13 = vld [vmem:[#allocation2] sm:$0xff]  ;;  %p504_p5 = scmp.lt.s32.totalorder %s324_s9, %s324_s9 }
  0x4c   :  { %v382_v8 = vpack.c.bf16 %v93_v6, %v92_v5  ;;  %v89_v10 = vld [vmem:[#allocation7 + $0x18] sm:$0xff]  ;;  %v84_v11 = vld [vmem:[#allocation5] sm:$0xff]  ;;  %379 = vmatprep.subr.bf16.mxu1 %v378_v3  ;;  %375 = vmatprep.mubr.msk.f32.mxu0 %vm94_vm0, %v82_v13  ;;  %v83_v15 = vld [vmem:[#allocation2 + $0x8] sm:$0xff] }
  0x4d   :  { %v390_v12 = vpack.c.bf16 %v89_v10, %v88_v9  ;;  %364 = vmatprep.mubr.msk.f32.mxu1 %vm94_vm0, %v84_v11  ;;  %387 = vmatprep.subr.bf16.mxu0 %v386_v7  ;;  %v85_v14 = vld [vmem:[#allocation5 + $0x8] sm:$0xff]  ;;  %v341_v18 = vld [vmem:[%s688_s4] ss:$0 sm:$0xff] }
  0x4e   :  { %381 = vmatpush3.bf16.msra.mxu1 %v378_v3  ;;  %389 = vmatpush3.bf16.msra.mxu0 %v386_v7  ;;  %v342_v49 = vld [vmem:[%s689_s5] ss:$0 sm:$0xff]  ;;  %s499_s5 = scalar_lea.vmem %s324_s9, 256 }
  0x4f   :  { %383 = vmatprep.subr.bf16.mxu1 %v382_v8  ;;  %391 = vmatprep.subr.bf16.mxu0 %v390_v12  ;;  %v343_v51 = vld [vmem:[%s690_s6] ss:$0 sm:$0xff]  ;;  %p500_p4 = scmp.ne.s32.totalorder %s324_s9, %s499_s5  ;;  %p505_p6 = scmp.lt.s32.totalorder %s499_s5, %s499_s5 }
  0x51   :  { %p506_p7 = por %p505_p6, %p504_p5 }
  0x52   :  { %385 = vmatpush3.bf16.msra.mxu1 %v382_v8  ;;  %393 = vmatpush3.bf16.msra.mxu0 %v390_v12 }
  0x53   :  { %p507_p8 = pnand %p506_p7, %p500_p4 }
  0x55   :  { %365 = vmatmul.mubr.msk.f32.vlgmr.msra.gmra.mrb[0].mxu1 %vm94_vm0, %v85_v14  ;;  %376 = vmatmul.mubr.msk.f32.vlgmr.msra.gmra.mrb[0].mxu0 %vm94_vm0, %v83_v15 }
 0x128   :  { %v366_v16 = vpop.f32.mrb[0].mxu1  ;;  %v377_v17 = vpop.f32.mrb[0].mxu0 }
 0x129   :  { %v167_v19 = vpop.f32.mrb[1].mxu1  ;;  %v254_v20 = vadd.f32 %v377_v17, %v366_v16  ;;  %v248_v21 = vpop.f32.mrb[1].mxu0 }
 0x12a   :  { %v249_v22 = vadd.f32 %v248_v21, %v167_v19 }
 0x12b   :  { %v265_v23 = vadd.f32 %v341_v18, %v254_v20 }
 0x12c   :  { %v264_v24 = vadd.f32 %v341_v18, %v249_v22 }
 0x12d   :  { %403 = vtanh.f32 %v265_v23 }
 0x12e   :  { %405 = vtanh.f32 %v264_v24 }
 0x137   :  { %v404_v25 = vpop.eup %403 }
 0x138   :  { %v406_v26 = vpop.eup %405  ;;  %v275_v30 = vmul.f32 %v404_v25, %v404_v25  ;;  %v271_v31 = vsel %vm94_vm0, %v404_v25, 0.0 }
 0x139   :  { %v268_v27 = vsel %vm94_vm0, %v406_v26, 0.0  ;;  %v274_v28 = vmul.f32 %v406_v26, %v406_v26 }
 0x13a   :  { %269 = vadd.xlane.f32.xlu0 %v268_v27  ;;  %v279_v32 = vsel %vm94_vm0, %v275_v30, 0.0 }
 0x13b   :  { %v276_v29 = vsel %vm94_vm0, %v274_v28, 0.0 }
 0x13c   :  { %277 = vadd.xlane.f32.xlu1 %v276_v29 }
 0x13e   :  { %272 = vadd.xlane.f32.xlu0 %v271_v31 }
 0x140   :  { %280 = vadd.xlane.f32.xlu1 %v279_v32 }
 0x1c7   :  { %v270_v33 = vpop.xlane.xlu0 %269 }
 0x1c8   :  { %v282_v34 = vmul.f32 0.03125, %v270_v33 }
 0x1c9   :  { %v278_v35 = vpop.xlane.xlu1 %277 }
 0x1ca   :  { %v286_v36 = vmul.f32 %v282_v34, %v282_v34  ;;  %v284_v37 = vmul.f32 0.03125, %v278_v35  ;;  %v290_v47 = vsub.f32 %v406_v26, %v282_v34 }
 0x1cb   :  { %v273_v38 = vpop.xlane.xlu0 %272 }
 0x1cc   :  { %v288_v39 = vsub.f32 %v284_v37, %v286_v36  ;;  %v283_v40 = vmul.f32 0.03125, %v273_v38 }
 0x1cd   :  { %v281_v41 = vpop.xlane.xlu1 %280 }
 0x1ce   :  { %v292_v42 = vadd.f32 1e-05, %v288_v39  ;;  %v287_v43 = vmul.f32 %v283_v40, %v283_v40  ;;  %v285_v44 = vmul.f32 0.03125, %v281_v41  ;;  %v291_v52 = vsub.f32 %v404_v25, %v283_v40 }
 0x1d0   :  { %407 = vrsqrt.f32 %v292_v42  ;;  %v289_v45 = vsub.f32 %v285_v44, %v287_v43 }
 0x1d2   :  { %v293_v46 = vadd.f32 1e-05, %v289_v45 }
 0x1d4   :  { %409 = vrsqrt.f32 %v293_v46 }
 0x1da   :  { %v408_v48 = vpop.eup %407 }
 0x1db   :  { %v296_v50 = vmul.f32 %v408_v48, %v290_v47 }
 0x1dd   :  { %v305_v53 = vmul.f32 %v342_v49, %v296_v50 }
 0x1de   :  { %v410_v54 = vpop.eup %409 }
 0x1df   :  { %v297_v55 = vmul.f32 %v410_v54, %v291_v52  ;;  %v314_v56 = vadd.f32 %v343_v51, %v305_v53 }
 0x1e1   :  { %v306_v57 = vmul.f32 %v342_v49, %v297_v55  ;;  %316 = vst.msk [vmem:[#allocation10] sm:$0xff] %vm94_vm0, %v314_v56 }
 0x1e3   :  { %v315_v58 = vadd.f32 %v343_v51, %v306_v57 }
 0x1e5   :  { %317 = vst.msk [vmem:[#allocation10 + $0x8] sm:$0xff] %vm94_vm0, %v315_v58 }
 0x1e6   :  { %510 = shalt.err (!%p507_p8)
}
 0x1e7   :  { %s511_s11 = scalar_lea.hbm %s691_s7, 256 }
 0x1e8   :  { %p512_p9 = scmp.ne.s32.totalorder %s691_s7, %s511_s11  ;;  %p515_p10 = scmp.lt.u32.totalorder %s511_s11, %s691_s7 }
 0x1ea   :  { %p517_p11 = pnand %p515_p10, %p512_p9 }
 0x1ec   :  { %520 = shalt.err (!%p517_p11)
}
 0x1ed   :  { %329 = dma.vmem_to_hbm [thread:$0]  %s324_s9, 256, %s691_s7, [#allocation4], %s531_s13, %s531_s13, %s532_s14  }
 0x1ee   :  { %527 = dma.done.wait [#allocation4], 256  }
 0x1ef   :  { %528 = vsyncadd [#allocation4], 4294967040 }
 0x1f0   :  { %333 = vsyncpa [#allocation3], 1 }
 0x1f1   :  { %334 = vsyncpa [#allocation6], 1 }
 0x1f2   :  { %335 = vsyncpa [#allocation9], 1 }
 0x1f3   :  { %336 = vsyncpa [#allocation4], 1 }

</bundles_post_ra>
